<compile_context>
chip_gen: v7x
topology: tpu7x:2x2x1
jax: 0.10.0
libtpu: 0.0.40
codegen_flags: <defaults>
</compile_context>

<pallas_src>
import jax
import jax.numpy as jnp
from jax import lax
from jax.experimental import pallas as pl
from jax.experimental.pallas import tpu as pltpu

IN_FEATURES = 784          # 28 * 28 (unpadded contraction dim)
NUM_HIDDEN = 256
NUM_CLASSES = 10
N_PAD = 128                # lane-dense fc2 output width (10 -> 128)
BN_EPS = 1e-5
TB_CAP = 512               # batch-tile cap: amortizes ~0.35us/step, stays tiny in VMEM


def mnist_kernel(x_ref, w1_ref, b1_ref, w2_ref, b2_ref, o_ref):
    # fc1 (eval-BN folded into w1/b1): (TB, 784)bf16 @ (784, 256)bf16 -> f32 accum
    h = jnp.dot(x_ref[...], w1_ref[...], preferred_element_type=jnp.float32)
    h = jnp.maximum(h + b1_ref[...], 0.0)                # bias + ReLU, f32
    # dropout: identity in eval mode
    # TODO(synk): training-mode dropout (prng mask) / BN batch-statistics not implemented; eval forward only.

    # fc2: (TB, 256)bf16 @ (256, 128)bf16 -> f32 accum, stored as bf16 (padded lanes)
    out = jnp.dot(h.astype(jnp.bfloat16), w2_ref[...],
                  preferred_element_type=jnp.float32)
    o_ref[...] = (out + b2_ref[...]).astype(o_ref.dtype)


def _round_up(x, m):
    return (x + m - 1) // m * m


def _pick_batch_tile(B):
    """Batch tile: multiple of 16 (bf16 sublane packing), capped at TB_CAP,
    and chosen so there are >= 2 grid steps whenever the batch allows it
    (lets the 'parallel' axis shard across v7x's two TensorCores)."""
    b16 = _round_up(max(B, 1), 16)
    if b16 <= 16:
        return b16
    half = _round_up((b16 + 1) // 2, 16)
    return min(TB_CAP, half)


def mnist_forward(x_nchw, params):
    """x_nchw: (B, 1, 28, 28) f32. params: PyTorch-equivalent eval-mode parameters.
    Returns (B, 10) f32 logits."""
    w1, b1, gamma, beta, rmean, rvar, w2, b2 = params

    B = x_nchw.shape[0]

    # ---- one-time constant transforms (outside the kernel) ----
    # Fold eval-mode BatchNorm into fc1: y = ((x@w1 + b1) - mu) * g/sqrt(v+eps) + beta
    scale = gamma * lax.rsqrt(rvar + BN_EPS)              # (1, 256)
    w1_bf = (w1 * scale).astype(jnp.bfloat16)              # (784, 256) bf16 MXU operand
    b1_f = (b1 - rmean) * scale + beta                     # (1, 256) f32

    # Pad fc2 output 10 -> 128 lanes (dense vst); bias stays f32.
    w2_bf = jnp.zeros((NUM_HIDDEN, N_PAD), jnp.bfloat16).at[:, :NUM_CLASSES].set(
        w2.astype(jnp.bfloat16))
    b2_p = jnp.zeros((1, N_PAD), jnp.float32).at[:, :NUM_CLASSES].set(b2)

    # ---- activations: flatten, cast to bf16 FIRST, pad only the batch dim ----
    x_bf = x_nchw.reshape(B, IN_FEATURES).astype(jnp.bfloat16)   # (B, 784) bf16

    TB = _pick_batch_tile(B)
    B_pad = _round_up(B, TB)
    if B_pad != B:
        x_bf = jnp.pad(x_bf, ((0, B_pad - B), (0, 0)))           # cheap bf16 pad
    grid_b = B_pad // TB

    out_padded = pl.pallas_call(
        mnist_kernel,
        out_shape=jax.ShapeDtypeStruct((B_pad, N_PAD), jnp.bfloat16),
        grid_spec=pltpu.PrefetchScalarGridSpec(
            num_scalar_prefetch=0,
            grid=(grid_b,),
            in_specs=[
                # x tile streams; last dim == full array dim (784) so no lane padding needed
                pl.BlockSpec((TB, IN_FEATURES), lambda i: (i, 0)),
                # weights / biases: constant index_map -> VMEM-resident across the grid
                pl.BlockSpec((IN_FEATURES, NUM_HIDDEN), lambda i: (0, 0)),
                pl.BlockSpec((1, NUM_HIDDEN), lambda i: (0, 0)),
                pl.BlockSpec((NUM_HIDDEN, N_PAD), lambda i: (0, 0)),
                pl.BlockSpec((1, N_PAD), lambda i: (0, 0)),
            ],
            out_specs=pl.BlockSpec((TB, N_PAD), lambda i: (i, 0)),
        ),
        compiler_params=pltpu.CompilerParams(
            dimension_semantics=("parallel",),
            vmem_limit_bytes=32 << 20,
        ),
    )(x_bf, w1_bf, b1_f, w2_bf, b2_p)

    # slice off batch/class padding, then upcast logits to f32 for downstream consumers
    return out_padded[:B, :NUM_CLASSES].astype(jnp.float32)


def init_params(key):
    k1, k2 = jax.random.split(key, 2)
    # fc1: kaiming_normal_(fan_in, relu) -> std = sqrt(2 / fan_in); stored (in, out)
    std1 = (2.0 / IN_FEATURES) ** 0.5
    w1 = std1 * jax.random.normal(k1, (IN_FEATURES, NUM_HIDDEN), dtype=jnp.float32)
    b1 = jnp.zeros((1, NUM_HIDDEN), dtype=jnp.float32)
    # bn1: gamma=1, beta=0, running_mean=0, running_var=1 (PyTorch defaults)
    gamma = jnp.ones((1, NUM_HIDDEN), dtype=jnp.float32)
    beta = jnp.zeros((1, NUM_HIDDEN), dtype=jnp.float32)
    rmean = jnp.zeros((1, NUM_HIDDEN), dtype=jnp.float32)
    rvar = jnp.ones((1, NUM_HIDDEN), dtype=jnp.float32)
    # fc2: xavier_normal_ -> std = sqrt(2 / (fan_in + fan_out)); stored (in, out)
    std2 = (2.0 / (NUM_HIDDEN + NUM_CLASSES)) ** 0.5
    w2 = std2 * jax.random.normal(k2, (NUM_HIDDEN, NUM_CLASSES), dtype=jnp.float32)
    b2 = jnp.zeros((1, NUM_CLASSES), dtype=jnp.float32)
    return (w1, b1, gamma, beta, rmean, rvar, w2, b2)


if __name__ == "__main__":
    key = jax.random.PRNGKey(0)
    k_x, k_p = jax.random.split(key)

    B = 8
    x = jax.random.normal(k_x, (B, 1, 28, 28), dtype=jnp.float32)  # NCHW like MNIST
    params = init_params(k_p)

    out = mnist_forward(x, params)
    out = jax.block_until_ready(out)

    # sanity: f32 plain-JAX reference of the same eval-mode forward pass
    w1, b1, gamma, beta, rmean, rvar, w2, b2 = params
    xf = x.reshape(B, -1)
    h = xf @ w1 + b1
    h = (h - rmean) * lax.rsqrt(rvar + BN_EPS) * gamma + beta
    h = jnp.maximum(h, 0.0)
    ref = h @ w2 + b2

    assert out.shape == (B, NUM_CLASSES)
    # tolerance loosened for bf16 matmul inputs + bf16 output storage (f32 accumulation)
    assert jnp.allclose(out, ref, atol=1e-1, rtol=5e-2), float(jnp.max(jnp.abs(out - ref)))

    print("KERNEL_OK")
</pallas_src>

<mosaic_0001>
module attributes {stable_mosaic.version = 11 : i64} {
  func.func @mnist_kernel(%arg0: i32, %arg1: memref<16x784xbf16, #tpu.memory_space<vmem>>, %arg2: memref<784x256xbf16, #tpu.memory_space<vmem>>, %arg3: memref<1x256xf32, #tpu.memory_space<vmem>>, %arg4: memref<256x128xbf16, #tpu.memory_space<vmem>>, %arg5: memref<1x128xf32, #tpu.memory_space<vmem>>, %arg6: memref<16x128xbf16, #tpu.memory_space<vmem>>) attributes {dimension_semantics = [#tpu.dimension_semantics<parallel>], iteration_bounds = array<i64: 1>, scalar_prefetch = 0 : i64, scratch_operands = 0 : i64, tpu.core_type = #tpu.core_type<tc>, window_params = [{transform_indices = @transform_0, window_bounds = array<i64: 16, 784>}, {pipeline_mode = #tpu.pipeline_mode<synchronous>, transform_indices = @transform_1, window_bounds = array<i64: 784, 256>}, {pipeline_mode = #tpu.pipeline_mode<synchronous>, transform_indices = @transform_2, window_bounds = array<i64: 1, 256>}, {pipeline_mode = #tpu.pipeline_mode<synchronous>, transform_indices = @transform_3, window_bounds = array<i64: 256, 128>}, {pipeline_mode = #tpu.pipeline_mode<synchronous>, transform_indices = @transform_4, window_bounds = array<i64: 1, 128>}, {transform_indices = @transform_5, window_bounds = array<i64: 16, 128>}]} {
    %c0 = arith.constant 0 : index
    %c0_0 = arith.constant 0 : index
    %0 = vector.load %arg1[%c0, %c0_0] : memref<16x784xbf16, #tpu.memory_space<vmem>>, vector<16x784xbf16>
    %c0_1 = arith.constant 0 : index
    %c0_2 = arith.constant 0 : index
    %1 = vector.load %arg2[%c0_1, %c0_2] : memref<784x256xbf16, #tpu.memory_space<vmem>>, vector<784x256xbf16>
    %cst = arith.constant dense<0.000000e+00> : vector<16x256xf32>
    %2 = tpu.matmul %0, %1, %cst {dimension_numbers = #tpu.dot_dimension_numbers<[1], [0], [0], [1], [0, 0, 1, 1], [], []>} : vector<16x784xbf16>, vector<784x256xbf16>, vector<16x256xf32> -> vector<16x256xf32>
    %c0_3 = arith.constant 0 : index
    %c0_4 = arith.constant 0 : index
    %3 = vector.load %arg3[%c0_3, %c0_4] : memref<1x256xf32, #tpu.memory_space<vmem>>, vector<1x256xf32>
    %4 = vector.broadcast %3 : vector<1x256xf32> to vector<16x256xf32>
    %5 = arith.addf %2, %4 : vector<16x256xf32>
    %cst_5 = arith.constant 0.000000e+00 : f32
    %6 = vector.broadcast %cst_5 : f32 to vector<16x256xf32>
    %7 = arith.maximumf %5, %6 : vector<16x256xf32>
    %8 = arith.truncf %7 : vector<16x256xf32> to vector<16x256xbf16>
    %c0_6 = arith.constant 0 : index
    %c0_7 = arith.constant 0 : index
    %9 = vector.load %arg4[%c0_6, %c0_7] : memref<256x128xbf16, #tpu.memory_space<vmem>>, vector<256x128xbf16>
    %cst_8 = arith.constant dense<0.000000e+00> : vector<16x128xf32>
    %10 = tpu.matmul %8, %9, %cst_8 {dimension_numbers = #tpu.dot_dimension_numbers<[1], [0], [0], [1], [0, 0, 1, 1], [], []>} : vector<16x256xbf16>, vector<256x128xbf16>, vector<16x128xf32> -> vector<16x128xf32>
    %c0_9 = arith.constant 0 : index
    %c0_10 = arith.constant 0 : index
    %11 = vector.load %arg5[%c0_9, %c0_10] : memref<1x128xf32, #tpu.memory_space<vmem>>, vector<1x128xf32>
    %12 = vector.broadcast %11 : vector<1x128xf32> to vector<16x128xf32>
    %13 = arith.addf %10, %12 : vector<16x128xf32>
    %14 = arith.truncf %13 : vector<16x128xf32> to vector<16x128xbf16>
    %c0_11 = arith.constant 0 : index
    %c0_12 = arith.constant 0 : index
    %15 = vector.load %arg6[%c0_11, %c0_12] : memref<16x128xbf16, #tpu.memory_space<vmem>>, vector<16x128xbf16>
    tpu.vector_store %arg6[%c0_11, %c0_12], %14 {strides = array<i32>} : memref<16x128xbf16, #tpu.memory_space<vmem>>, vector<16x128xbf16>,
    return
  }
  func.func @transform_0(%arg0: i32) -> (i32, i32) {
    %c0_i32 = arith.constant 0 : i32
    %c0_i32_0 = arith.constant 0 : i32
    return %arg0, %c0_i32 : i32, i32
  }
  func.func @transform_1(%arg0: i32) -> (i32, i32) {
    %c0_i32 = arith.constant 0 : i32
    %c0_i32_0 = arith.constant 0 : i32
    %c0_i32_1 = arith.constant 0 : i32
    return %c0_i32, %c0_i32_0 : i32, i32
  }
  func.func @transform_2(%arg0: i32) -> (i32, i32) {
    %c0_i32 = arith.constant 0 : i32
    %c0_i32_0 = arith.constant 0 : i32
    %c0_i32_1 = arith.constant 0 : i32
    return %c0_i32, %c0_i32_0 : i32, i32
  }
  func.func @transform_3(%arg0: i32) -> (i32, i32) {
    %c0_i32 = arith.constant 0 : i32
    %c0_i32_0 = arith.constant 0 : i32
    %c0_i32_1 = arith.constant 0 : i32
    return %c0_i32, %c0_i32_0 : i32, i32
  }
  func.func @transform_4(%arg0: i32) -> (i32, i32) {
    %c0_i32 = arith.constant 0 : i32
    %c0_i32_0 = arith.constant 0 : i32
    %c0_i32_1 = arith.constant 0 : i32
    return %c0_i32, %c0_i32_0 : i32, i32
  }
  func.func @transform_5(%arg0: i32) -> (i32, i32) {
    %c0_i32 = arith.constant 0 : i32
    %c0_i32_0 = arith.constant 0 : i32
    return %arg0, %c0_i32 : i32, i32
  }
}

</mosaic_0001>

<bundles_post_ra>
// kernel: tpu_custom_call.1
= control target key start
LH: loop header
LB: loop body
LE: loop exit
PB: predicated region body
PF: predicated region fallthrough
CT: control target
= control target key end

     0   :  { %10 = vsyncpa [#allocation3], 0  ;;  %s1641_s0 = inlined_call_operand.hbm [shape: bf16[16,784], index: 0, kind: input, shape index: {}]   ;;  %s1642_s1 = inlined_call_operand.hbm [shape: bf16[784,256], index: 1, kind: input, shape index: {}]   ;;  %s1643_s2 = inlined_call_operand.vmem [shape: f32[1,256], index: 2, kind: input, shape index: {}]   ;;  %s1644_s3 = inlined_call_operand.hbm [shape: bf16[256,128], index: 3, kind: input, shape index: {}]   ;;  %s1645_s4 = inlined_call_operand.vmem [shape: f32[1,128], index: 4, kind: input, shape index: {}]   ;;  %s1646_s5 = inlined_call_operand.hbm [shape: bf16[16,128], index: 5, kind: output, shape index: {}]  }
   0x1   :  { %11 = vsyncpa [#allocation6], 0 }
   0x2   :  { %12 = vsyncpa [#allocation4], 0  ;;  %s1540_s18 = smov [#allocation5]   ;;  %s1446_s22 = scalar_lea.hbm %s1642_s1, 12544 }
   0x3   :  { %s30_s19 = sshll.u32 %s1540_s18, 4  ;;  %p1447_p0 = scmp.ne.s32.totalorder %s1642_s1, %s1446_s22  ;;  %s31_s19 = int_to_ptr.vmem [resolvable:$true] %s30_s19 }
   0x4   :  { %p1450_p1 = scmp.lt.u32.totalorder %s1446_s22, %s1642_s1 }
   0x6   :  { %p1452_p2 = pnand %p1450_p1, %p1447_p0 }
   0x8   :  { %1455 = shalt.err (!%p1452_p2)
}
   0x9   :  { %s1456_s27 = scalar_lea.vmem %s31_s19, 12544  ;;  %p1461_p4 = scmp.lt.s32.totalorder %s31_s19, %s31_s19 }
   0xa   :  { %p1457_p3 = scmp.ne.s32.totalorder %s31_s19, %s1456_s27  ;;  %p1462_p5 = scmp.lt.s32.totalorder %s1456_s27, %s1456_s27 }
   0xc   :  { %p1463_p6 = por %p1462_p5, %p1461_p4 }
   0xe   :  { %p1464_p7 = pnand %p1463_p6, %p1457_p3 }
  0x10   :  { %1467 = shalt.err (!%p1464_p7)
}
  0x11   :  { %s1541_s28 = smov 128   ;;  %s1542_s29 = smov 8  }
  0x12   :  { %36 = dma.hbm_to_vmem [thread:$0]  %s1642_s1, 12544, %s31_s19, [#allocation6], %s1541_s28, %s1541_s28, %s1542_s29  }
  0x13   :  { %s1543_s7 = smov [#allocation2]   ;;  %s1468_s11 = scalar_lea.hbm %s1641_s0, 896 }
  0x14   :  { %s18_s8 = sshll.u32 %s1543_s7, 4  ;;  %p1469_p8 = scmp.ne.s32.totalorder %s1641_s0, %s1468_s11  ;;  %s19_s8 = int_to_ptr.vmem [resolvable:$true] %s18_s8 }
  0x15   :  { %p1472_p9 = scmp.lt.u32.totalorder %s1468_s11, %s1641_s0 }
  0x17   :  { %p1474_p10 = pnand %p1472_p9, %p1469_p8 }
  0x19   :  { %1477 = shalt.err (!%p1474_p10)
}
  0x1a   :  { %s1478_s16 = scalar_lea.vmem %s19_s8, 896  ;;  %p1483_p12 = scmp.lt.s32.totalorder %s19_s8, %s19_s8 }
  0x1b   :  { %p1479_p11 = scmp.ne.s32.totalorder %s19_s8, %s1478_s16  ;;  %p1484_p13 = scmp.lt.s32.totalorder %s1478_s16, %s1478_s16 }
  0x1d   :  { %p1485_p0 = por %p1484_p13, %p1483_p12 }
  0x1f   :  { %p1486_p1 = pnand %p1485_p0, %p1479_p11 }
  0x21   :  { %1489 = shalt.err (!%p1486_p1)
}
  0x22   :  { %s1544_s1 = smov 448   ;;  %s1545_s17 = smov 28  }
  0x23   :  { %24 = dma.hbm_to_vmem [thread:$0]  %s1641_s0, 896, %s19_s8, [#allocation3], %s1544_s1, %s1544_s1, %s1545_s17  }
  0x24   :  { %s1546_s20 = smov [#allocation7]   ;;  %s1490_s24 = scalar_lea.hbm %s1644_s3, 2048 }
  0x25   :  { %s44_s21 = sshll.u32 %s1546_s20, 4  ;;  %p1491_p2 = scmp.ne.s32.totalorder %s1644_s3, %s1490_s24  ;;  %s45_s21 = int_to_ptr.vmem [resolvable:$true] %s44_s21 }
  0x26   :  { %p1494_p3 = scmp.lt.u32.totalorder %s1490_s24, %s1644_s3 }
  0x28   :  { %p1496_p4 = pnand %p1494_p3, %p1491_p2 }
  0x2a   :  { %1499 = shalt.err (!%p1496_p4)
}
  0x2b   :  { %s1500_s29 = scalar_lea.vmem %s45_s21, 2048  ;;  %p1505_p6 = scmp.lt.s32.totalorder %s45_s21, %s45_s21 }
  0x2c   :  { %p1501_p5 = scmp.ne.s32.totalorder %s45_s21, %s1500_s29  ;;  %p1506_p7 = scmp.lt.s32.totalorder %s1500_s29, %s1500_s29 }
  0x2e   :  { %p1507_p8 = por %p1506_p7, %p1505_p6 }
  0x30   :  { %p1508_p9 = pnand %p1507_p8, %p1501_p5 }
  0x32   :  { %1511 = shalt.err (!%p1508_p9)
}
  0x33   :  { %s1547_s0 = smov 64   ;;  %s1548_s30 = smov 4  }
  0x34   :  { %50 = dma.hbm_to_vmem [thread:$0]  %s1644_s3, 2048, %s45_s21, [#allocation6], %s1547_s0, %s1547_s0, %s1548_s30  }
  0x35   :  { %1534 = dma.done.wait [#allocation3], 896  }
  0x36   :  { %1535 = vsyncadd [#allocation3], 4294966400 }
  0x37   :  { %1536 = dma.done.wait [#allocation6], 14592  }
  0x38   :  { %1537 = vsyncadd [#allocation6], 4294952704  ;;  %v1273_v0 = vld [vmem:[#allocation5 + $0x104] ss:$8 sps:$4 sm:$0xff]   ;;  %v1275_v1 = vld [vmem:[#allocation5 + $0x100] ss:$8 sps:$4 sm:$0xff]  }
  0x39   :  { %753 = vmatprep.subr.bf16.mxu0 %v1273_v0  ;;  %v1276_v2 = vld [vmem:[#allocation5 + $0x114] ss:$8 sps:$4 sm:$0xff]   ;;  %v1278_v3 = vld [vmem:[#allocation5 + $0x110] ss:$8 sps:$4 sm:$0xff]   ;;  %v1279_v4 = vld [vmem:[#allocation5 + $0x124] ss:$8 sps:$4 sm:$0xff]  }
  0x3a   :  { %754 = vmatpush1.bf16.msra.mxu0 %v1275_v1  ;;  %v1281_v5 = vld [vmem:[#allocation5 + $0x120] ss:$8 sps:$4 sm:$0xff]   ;;  %v1282_v6 = vld [vmem:[#allocation5 + $0x134] ss:$8 sps:$4 sm:$0xff]   ;;  %v1284_v7 = vld [vmem:[#allocation5 + $0x130] ss:$8 sps:$4 sm:$0xff]  }
  0x3b   :  { %755 = vmatprep.subr.bf16.mxu0 %v1276_v2  ;;  %v1285_v8 = vld [vmem:[#allocation5 + $0x144] ss:$8 sps:$4 sm:$0xff]   ;;  %v1287_v9 = vld [vmem:[#allocation5 + $0x140] ss:$8 sps:$4 sm:$0xff]   ;;  %v1288_v10 = vld [vmem:[#allocation5 + $0x154] ss:$8 sps:$4 sm:$0xff]  }
  0x3c   :  { %v1290_v11 = vld [vmem:[#allocation5 + $0x150] ss:$8 sps:$4 sm:$0xff]   ;;  %v1315_v12 = vld [vmem:[#allocation5 + $0x4] ss:$8 sps:$4 sm:$0xff]   ;;  %v1317_v13 = vld [vmem:[#allocation5] ss:$8 sps:$4 sm:$0xff]  }
  0x3d   :  { %v1291_v14 = vld [vmem:[#allocation5 + $0x164] ss:$8 sps:$4 sm:$0xff]   ;;  %710 = vmatprep.subr.bf16.mxu1 %v1315_v12  ;;  %v1321_v15 = vld [vmem:[#allocation5 + $0x14] ss:$8 sps:$4 sm:$0xff]   ;;  %v1323_v16 = vld [vmem:[#allocation5 + $0x10] ss:$8 sps:$4 sm:$0xff]  }
  0x3e   :  { %756 = vmatpush1.bf16.msra.mxu0 %v1278_v3  ;;  %711 = vmatpush1.bf16.msra.mxu1 %v1317_v13  ;;  %v1293_v17 = vld [vmem:[#allocation5 + $0x160] ss:$8 sps:$4 sm:$0xff]   ;;  %v1294_v18 = vld [vmem:[#allocation5 + $0x174] ss:$8 sps:$4 sm:$0xff]   ;;  %v1327_v19 = vld [vmem:[#allocation5 + $0x24] ss:$8 sps:$4 sm:$0xff]  }
  0x3f   :  { %757 = vmatprep.subr.bf16.mxu0 %v1279_v4  ;;  %712 = vmatprep.subr.bf16.mxu1 %v1321_v15  ;;  %v1329_v20 = vld [vmem:[#allocation5 + $0x20] ss:$8 sps:$4 sm:$0xff]   ;;  %v1332_v21 = vld [vmem:[#allocation2 + $0xc] ss:$28 sps:$4 sm:$0xff]   ;;  %v1297_v23 = vld [vmem:[#allocation5 + $0x184] ss:$8 sps:$4 sm:$0xff]  }
  0x40   :  { %v1296_v22 = vld [vmem:[#allocation5 + $0x170] ss:$8 sps:$4 sm:$0xff]   ;;  %785 = vmatprep.mubr.bf16.mxu0 %v1332_v21  ;;  %v1336_v24 = vld [vmem:[#allocation5 + $0x34] ss:$8 sps:$4 sm:$0xff]   ;;  %v1299_v26 = vld [vmem:[#allocation5 + $0x180] ss:$8 sps:$4 sm:$0xff]  }
  0x41   :  { %v1338_v25 = vld [vmem:[#allocation5 + $0x30] ss:$8 sps:$4 sm:$0xff]   ;;  %v1342_v27 = vld [vmem:[#allocation5 + $0x44] ss:$8 sps:$4 sm:$0xff]   ;;  %v1300_v28 = vld [vmem:[#allocation5 + $0x194] ss:$8 sps:$4 sm:$0xff]  }
  0x42   :  { %758 = vmatpush1.bf16.msra.mxu0 %v1281_v5  ;;  %713 = vmatpush1.bf16.msra.mxu1 %v1323_v16  ;;  %v1344_v29 = vld [vmem:[#allocation5 + $0x40] ss:$8 sps:$4 sm:$0xff]   ;;  %v1302_v30 = vld [vmem:[#allocation5 + $0x190] ss:$8 sps:$4 sm:$0xff]   ;;  %v1348_v31 = vld [vmem:[#allocation5 + $0x54] ss:$8 sps:$4 sm:$0xff]  }
  0x43   :  { %759 = vmatprep.subr.bf16.mxu0 %v1282_v6  ;;  %714 = vmatprep.subr.bf16.mxu1 %v1327_v19  ;;  %v1303_v32 = vld [vmem:[#allocation5 + $0x1a4] ss:$8 sps:$4 sm:$0xff]   ;;  %v1350_v33 = vld [vmem:[#allocation5 + $0x50] ss:$8 sps:$4 sm:$0xff]   ;;  %v1305_v34 = vld [vmem:[#allocation5 + $0x1a0] ss:$8 sps:$4 sm:$0xff]  }
  0x44   :  { %v1354_v35 = vld [vmem:[#allocation5 + $0x64] ss:$8 sps:$4 sm:$0xff]   ;;  %v1306_v36 = vld [vmem:[#allocation5 + $0x1b4] ss:$8 sps:$4 sm:$0xff]   ;;  %v1356_v37 = vld [vmem:[#allocation5 + $0x60] ss:$8 sps:$4 sm:$0xff]  }
  0x45   :  { %v1308_v38 = vld [vmem:[#allocation5 + $0x1b0] ss:$8 sps:$4 sm:$0xff]   ;;  %v1360_v39 = vld [vmem:[#allocation5 + $0x74] ss:$8 sps:$4 sm:$0xff]   ;;  %v1309_v40 = vld [vmem:[#allocation5 + $0x1c4] ss:$8 sps:$4 sm:$0xff]  }
  0x46   :  { %760 = vmatpush1.bf16.msra.mxu0 %v1284_v7  ;;  %715 = vmatpush1.bf16.msra.mxu1 %v1329_v20  ;;  %v1362_v41 = vld [vmem:[#allocation5 + $0x70] ss:$8 sps:$4 sm:$0xff]   ;;  %v1311_v42 = vld [vmem:[#allocation5 + $0x1c0] ss:$8 sps:$4 sm:$0xff]   ;;  %v1366_v43 = vld [vmem:[#allocation5 + $0x84] ss:$8 sps:$4 sm:$0xff]  }
  0x47   :  { %761 = vmatprep.subr.bf16.mxu0 %v1285_v8  ;;  %716 = vmatprep.subr.bf16.mxu1 %v1336_v24  ;;  %v1312_v44 = vld [vmem:[#allocation5 + $0x1d4] ss:$8 sps:$4 sm:$0xff]   ;;  %v1368_v45 = vld [vmem:[#allocation5 + $0x80] ss:$8 sps:$4 sm:$0xff]   ;;  %v1314_v46 = vld [vmem:[#allocation5 + $0x1d0] ss:$8 sps:$4 sm:$0xff]  }
  0x48   :  { %v1372_v47 = vld [vmem:[#allocation5 + $0x94] ss:$8 sps:$4 sm:$0xff]   ;;  %v1318_v48 = vld [vmem:[#allocation5 + $0x1e4] ss:$8 sps:$4 sm:$0xff]   ;;  %v1374_v49 = vld [vmem:[#allocation5 + $0x90] ss:$8 sps:$4 sm:$0xff]  }
  0x49   :  { %v1320_v50 = vld [vmem:[#allocation5 + $0x1e0] ss:$8 sps:$4 sm:$0xff]   ;;  %v1378_v51 = vld [vmem:[#allocation5 + $0xa4] ss:$8 sps:$4 sm:$0xff]   ;;  %v1324_v52 = vld [vmem:[#allocation5 + $0x1f4] ss:$8 sps:$4 sm:$0xff]  }
  0x4a   :  { %762 = vmatpush1.bf16.msra.mxu0 %v1287_v9  ;;  %717 = vmatpush1.bf16.msra.mxu1 %v1338_v25  ;;  %v1380_v53 = vld [vmem:[#allocation5 + $0xa0] ss:$8 sps:$4 sm:$0xff]   ;;  %v1326_v54 = vld [vmem:[#allocation5 + $0x1f0] ss:$8 sps:$4 sm:$0xff]   ;;  %v1384_v55 = vld [vmem:[#allocation5 + $0xb4] ss:$8 sps:$4 sm:$0xff]  }
  0x4b   :  { %763 = vmatprep.subr.bf16.mxu0 %v1288_v10  ;;  %718 = vmatprep.subr.bf16.mxu1 %v1342_v27  ;;  %v1335_v56 = vld [vmem:[#allocation5 + $0x204] ss:$8 sps:$4 sm:$0xff]   ;;  %v1333_v58 = vld [vmem:[#allocation5 + $0x200] ss:$8 sps:$4 sm:$0xff]   ;;  %v1386_v59 = vld [vmem:[#allocation5 + $0xb0] ss:$8 sps:$4 sm:$0xff]  }
  0x4c   :  { %v1330_v57 = vld [vmem:[#allocation2 + $0x8] ss:$28 sps:$4 sm:$0xff]   ;;  %v1341_v62 = vld [vmem:[#allocation5 + $0x214] ss:$8 sps:$4 sm:$0xff]   ;;  %v1392_v63 = vld [vmem:[#allocation5 + $0xc0] ss:$8 sps:$4 sm:$0xff]  }
  0x4d   :  { %v1390_v60 = vld [vmem:[#allocation5 + $0xc4] ss:$8 sps:$4 sm:$0xff]   ;;  %v1339_v0 = vld [vmem:[#allocation5 + $0x210] ss:$8 sps:$4 sm:$0xff]   ;;  %v1396_v1 = vld [vmem:[#allocation5 + $0xd4] ss:$8 sps:$4 sm:$0xff]  }
  0x4e   :  { %764 = vmatpush1.bf16.msra.mxu0 %v1290_v11  ;;  %719 = vmatpush1.bf16.msra.mxu1 %v1344_v29  ;;  %v1416_v61 = vld [vmem:[#allocation2 + $0x4] ss:$28 sps:$4 sm:$0xff]   ;;  %v1428_v4 = vld [vmem:[#allocation2 + $0x14] ss:$28 sps:$4 sm:$0xff]   ;;  %v1430_v19 = vld [vmem:[#allocation7 + $0x40] sm:$0xff]   ;;  %v1549_v21 = vmov 0  }
  0x4f   :  { %765 = vmatprep.subr.bf16.mxu0 %v1291_v14  ;;  %720 = vmatprep.subr.bf16.mxu1 %v1348_v31  ;;  %v1347_v2 = vld [vmem:[#allocation5 + $0x224] ss:$8 sps:$4 sm:$0xff]   ;;  %v1345_v3 = vld [vmem:[#allocation5 + $0x220] ss:$8 sps:$4 sm:$0xff]   ;;  %v1398_v5 = vld [vmem:[#allocation5 + $0xd0] ss:$8 sps:$4 sm:$0xff]  }
  0x50   :  { %742 = vmatprep.mubr.bf16.mxu1 %v1416_v61  ;;  %v1402_v6 = vld [vmem:[#allocation5 + $0xe4] ss:$8 sps:$4 sm:$0xff]   ;;  %v1353_v7 = vld [vmem:[#allocation5 + $0x234] ss:$8 sps:$4 sm:$0xff]   ;;  %v1351_v8 = vld [vmem:[#allocation5 + $0x230] ss:$8 sps:$4 sm:$0xff]  }
  0x51   :  { %v1404_v9 = vld [vmem:[#allocation5 + $0xe0] ss:$8 sps:$4 sm:$0xff]   ;;  %v1408_v10 = vld [vmem:[#allocation5 + $0xf4] ss:$8 sps:$4 sm:$0xff]   ;;  %v1359_v11 = vld [vmem:[#allocation5 + $0x244] ss:$8 sps:$4 sm:$0xff]  }
  0x52   :  { %766 = vmatpush1.bf16.msra.mxu0 %v1293_v17  ;;  %721 = vmatpush1.bf16.msra.mxu1 %v1350_v33  ;;  %v1410_v12 = vld [vmem:[#allocation5 + $0xf0] ss:$8 sps:$4 sm:$0xff]   ;;  %v1357_v13 = vld [vmem:[#allocation5 + $0x240] ss:$8 sps:$4 sm:$0xff]   ;;  %v1422_v14 = vld [vmem:[#allocation5 + $0x304] ss:$8 sps:$4 sm:$0xff]  }
  0x53   :  { %767 = vmatprep.subr.bf16.mxu0 %v1294_v18  ;;  %722 = vmatprep.subr.bf16.mxu1 %v1354_v35  ;;  %v1365_v15 = vld [vmem:[#allocation5 + $0x254] ss:$8 sps:$4 sm:$0xff]   ;;  %v1414_v16 = vld [vmem:[#allocation2] ss:$28 sps:$4 sm:$0xff]   ;;  %v1363_v18 = vld [vmem:[#allocation5 + $0x250] ss:$8 sps:$4 sm:$0xff]  }
  0x54   :  { %v1420_v17 = vld [vmem:[#allocation5 + $0x300] ss:$8 sps:$4 sm:$0xff]   ;;  %v1371_v20 = vld [vmem:[#allocation5 + $0x264] ss:$8 sps:$4 sm:$0xff]   ;;  %vm706_vm0 = vcmask 130048   ;;  %v1431_v25 = vld [vmem:[#allocation7] sm:$0xff]  }
  0x55   :  { %v1429_v24 = vld [vmem:[#allocation2 + $0x18] ss:$28 sps:$4 sm:$0xff]   ;;  %v1395_v35 = vld [vmem:[#allocation5 + $0x2a4] ss:$8 sps:$4 sm:$0xff]   ;;  %s1550_s10 = smov [#allocation8]  }
  0x56   :  { %768 = vmatpush1.bf16.msra.mxu0 %v1296_v22  ;;  %723 = vmatpush1.bf16.msra.mxu1 %v1356_v37  ;;  %v1369_v22 = vld [vmem:[#allocation5 + $0x260] ss:$8 sps:$4 sm:$0xff]   ;;  %v1432_v27 = vld [vmem:[#allocation7 + $0x48] sm:$0xff]   ;;  %s1079_s11 = sshll.u32 %s1550_s10, 4  ;;  %s1080_s11 = int_to_ptr.vmem [resolvable:$true] %s1079_s11 }
  0x57   :  { %769 = vmatprep.subr.bf16.mxu0 %v1297_v23  ;;  %724 = vmatprep.subr.bf16.mxu1 %v1360_v39  ;;  %v1377_v23 = vld [vmem:[#allocation5 + $0x274] ss:$8 sps:$4 sm:$0xff]   ;;  %v1434_v31 = vld [vmem:[#allocation7 + $0x50] sm:$0xff]   ;;  %s1512_s12 = scalar_lea.vmem %s1080_s11, 128  ;;  %p1517_p11 = scmp.lt.s32.totalorder %s1080_s11, %s1080_s11 }
  0x58   :  { %v1433_v29 = vld [vmem:[#allocation7 + $0x8] sm:$0xff]   ;;  %v1435_v33 = vld [vmem:[#allocation7 + $0x10] sm:$0xff]   ;;  %p1513_p10 = scmp.ne.s32.totalorder %s1080_s11, %s1512_s12  ;;  %p1518_p12 = scmp.lt.s32.totalorder %s1512_s12, %s1512_s12 }
  0x59   :  { %v1401_v37 = vld [vmem:[#allocation5 + $0x2b4] ss:$8 sps:$4 sm:$0xff]   ;;  %v1407_v39 = vld [vmem:[#allocation5 + $0x2c4] ss:$8 sps:$4 sm:$0xff]  }
  0x5a   :  { %770 = vmatpush1.bf16.msra.mxu0 %v1299_v26  ;;  %725 = vmatpush1.bf16.msra.mxu1 %v1362_v41  ;;  %v1375_v26 = vld [vmem:[#allocation5 + $0x270] ss:$8 sps:$4 sm:$0xff]   ;;  %v1413_v41 = vld [vmem:[#allocation5 + $0x2d4] ss:$8 sps:$4 sm:$0xff]   ;;  %p1519_p13 = por %p1518_p12, %p1517_p11 }
  0x5b   :  { %771 = vmatprep.subr.bf16.mxu0 %v1300_v28  ;;  %726 = vmatprep.subr.bf16.mxu1 %v1366_v43  ;;  %v1383_v28 = vld [vmem:[#allocation5 + $0x284] ss:$8 sps:$4 sm:$0xff]  }
  0x5c   :  { %v1419_v43 = vld [vmem:[#allocation5 + $0x2e4] ss:$8 sps:$4 sm:$0xff]   ;;  %p1520_p0 = pnand %p1519_p13, %p1513_p10 }
  0x5e   :  { %772 = vmatpush1.bf16.msra.mxu0 %v1302_v30  ;;  %727 = vmatpush1.bf16.msra.mxu1 %v1368_v45  ;;  %v1381_v30 = vld [vmem:[#allocation5 + $0x280] ss:$8 sps:$4 sm:$0xff]   ;;  %v1425_v45 = vld [vmem:[#allocation5 + $0x2f4] ss:$8 sps:$4 sm:$0xff]  }
  0x5f   :  { %773 = vmatprep.subr.bf16.mxu0 %v1303_v32  ;;  %728 = vmatprep.subr.bf16.mxu1 %v1372_v47  ;;  %v1389_v32 = vld [vmem:[#allocation5 + $0x294] ss:$8 sps:$4 sm:$0xff]  }
  0x60   :  { %v1426_v47 = vld [vmem:[#allocation2 + $0x10] ss:$28 sps:$4 sm:$0xff]  }
  0x62   :  { %774 = vmatpush1.bf16.msra.mxu0 %v1305_v34  ;;  %729 = vmatpush1.bf16.msra.mxu1 %v1374_v49  ;;  %v1387_v34 = vld [vmem:[#allocation5 + $0x290] ss:$8 sps:$4 sm:$0xff]   ;;  %v1437_v49 = vld [vmem:[#allocation7 + $0x18] sm:$0xff]  }
  0x63   :  { %775 = vmatprep.subr.bf16.mxu0 %v1306_v36  ;;  %730 = vmatprep.subr.bf16.mxu1 %v1378_v51  ;;  %v1393_v36 = vld [vmem:[#allocation5 + $0x2a0] ss:$8 sps:$4 sm:$0xff]   ;;  %v1439_v51 = vld [vmem:[#allocation7 + $0x20] sm:$0xff]  }
  0x66   :  { %776 = vmatpush1.bf16.msra.mxu0 %v1308_v38  ;;  %731 = vmatpush1.bf16.msra.mxu1 %v1380_v53  ;;  %v1399_v38 = vld [vmem:[#allocation5 + $0x2b0] ss:$8 sps:$4 sm:$0xff]  }
  0x67   :  { %777 = vmatprep.subr.bf16.mxu0 %v1309_v40  ;;  %732 = vmatprep.subr.bf16.mxu1 %v1384_v55  ;;  %v1405_v40 = vld [vmem:[#allocation5 + $0x2c0] ss:$8 sps:$4 sm:$0xff]   ;;  %v1441_v53 = vld [vmem:[#allocation7 + $0x28] sm:$0xff]  }
  0x68   :  { %v1443_v55 = vld [vmem:[#allocation7 + $0x30] sm:$0xff]  }
  0x6a   :  { %778 = vmatpush1.bf16.msra.mxu0 %v1311_v42  ;;  %733 = vmatpush1.bf16.msra.mxu1 %v1386_v59  ;;  %v1411_v42 = vld [vmem:[#allocation5 + $0x2d0] ss:$8 sps:$4 sm:$0xff]  }
  0x6b   :  { %779 = vmatprep.subr.bf16.mxu0 %v1312_v44  ;;  %734 = vmatprep.subr.bf16.mxu1 %v1390_v60  ;;  %v1417_v44 = vld [vmem:[#allocation5 + $0x2e0] ss:$8 sps:$4 sm:$0xff]  }
  0x6e   :  { %780 = vmatpush1.bf16.msra.mxu0 %v1314_v46  ;;  %735 = vmatpush1.bf16.msra.mxu1 %v1392_v63  ;;  %v1423_v46 = vld [vmem:[#allocation5 + $0x2f0] ss:$8 sps:$4 sm:$0xff]  }
  0x6f   :  { %781 = vmatprep.subr.bf16.mxu0 %v1318_v48  ;;  %736 = vmatprep.subr.bf16.mxu1 %v1396_v1  ;;  %v1436_v48 = vld [vmem:[#allocation7 + $0x58] sm:$0xff]  }
  0x72   :  { %782 = vmatpush1.bf16.msra.mxu0 %v1320_v50  ;;  %737 = vmatpush1.bf16.msra.mxu1 %v1398_v5  ;;  %v1438_v50 = vld [vmem:[#allocation7 + $0x60] sm:$0xff]   ;;  %v169_v5 = vld [vmem:[%s1643_s2] sm:$0x3] }
  0x73   :  { %783 = vmatprep.subr.bf16.mxu0 %v1324_v52  ;;  %738 = vmatprep.subr.bf16.mxu1 %v1402_v6  ;;  %v1440_v52 = vld [vmem:[#allocation7 + $0x68] sm:$0xff]  }
  0x76   :  { %784 = vmatpush1.bf16.msra.mxu0 %v1326_v54  ;;  %739 = vmatpush1.bf16.msra.mxu1 %v1404_v9  ;;  %v1442_v54 = vld [vmem:[#allocation7 + $0x70] sm:$0xff]  }
  0x77   :  { %796 = vmatprep.subr.bf16.mxu0 %v1335_v56  ;;  %740 = vmatprep.subr.bf16.mxu1 %v1408_v10  ;;  %v1444_v56 = vld [vmem:[#allocation7 + $0x78] sm:$0xff]  }
  0x79   :  { %786 = vmatmul.mubr.bf16.vlgmr.msra.gmra.mrb[0].mxu0 %v1330_v57  ;;  %v1445_v57 = vld [vmem:[#allocation7 + $0x38] sm:$0xff]  }
  0x7a   :  { %797 = vmatpush1.bf16.msra.mxu0 %v1333_v58  ;;  %828 = vmatprep.mubr.bf16.mxu0 %v1428_v4 }
  0x7b   :  { %798 = vmatprep.subr.bf16.mxu0 %v1341_v62  ;;  %741 = vmatpush1.bf16.msra.mxu1 %v1410_v12 }
  0x7c   :  { %839 = vmatprep.subr.bf16.mxu1 %v1422_v14 }
  0x7e   :  { %799 = vmatpush1.bf16.msra.mxu0 %v1339_v0  ;;  %743 = vmatmul.mubr.bf16.vlgmr.msra.gmra.mrb[0].mxu1 %v1414_v16 }
  0x7f   :  { %800 = vmatprep.subr.bf16.mxu0 %v1347_v2  ;;  %840 = vmatpush1.bf16.msra.mxu1 %v1420_v17  ;;  %v171_v2 = vlaneseq }
  0x80   :  { %871 = vmatprep.mubr.bf16.mxu1 %v1549_v21  ;;  %1224 = vmatprep.subr.bf16.mxu1 %v1430_v19 }
  0x82   :  { %801 = vmatpush1.bf16.msra.mxu0 %v1345_v3  ;;  %v172_v3 = vshrl.u32 %v171_v2, 7 }
  0x83   :  { %802 = vmatprep.subr.bf16.mxu0 %v1353_v7 }
  0x84   :  { %v173_v4 = vsub.s32 0, %v172_v3  ;;  %v177_v6 = vsub.s32 1, %v172_v3 }
  0x86   :  { %803 = vmatpush1.bf16.msra.mxu0 %v1351_v8  ;;  %1197 = vmatmul.mubr.msk.bf16.vlgmr.msra.gmra.mrb[4].mxu1 %vm706_vm0, %v1429_v24  ;;  %v174_v7 = vrot.slane %v169_v5, %v173_v4  ;;  %v178_v8 = vrot.slane %v169_v5, %v177_v6 }
  0x87   :  { %804 = vmatprep.subr.bf16.mxu0 %v1359_v11  ;;  %1225 = vmatpush3.bf16.msra.mxu1 %v1431_v25 }
  0x88   :  { %1226 = vmatprep.subr.bf16.mxu1 %v1432_v27 }
  0x8a   :  { %805 = vmatpush1.bf16.msra.mxu0 %v1357_v13 }
  0x8b   :  { %806 = vmatprep.subr.bf16.mxu0 %v1365_v15  ;;  %1227 = vmatpush3.bf16.msra.mxu1 %v1433_v29 }
  0x8c   :  { %1228 = vmatprep.subr.bf16.mxu1 %v1434_v31 }
  0x8e   :  { %807 = vmatpush1.bf16.msra.mxu0 %v1363_v18 }
  0x8f   :  { %808 = vmatprep.subr.bf16.mxu0 %v1371_v20  ;;  %1229 = vmatpush3.bf16.msra.mxu1 %v1435_v33 }
  0x90   :  { %1230 = vmatprep.subr.bf16.mxu1 %v1436_v48 }
  0x92   :  { %809 = vmatpush1.bf16.msra.mxu0 %v1369_v22 }
  0x93   :  { %810 = vmatprep.subr.bf16.mxu0 %v1377_v23  ;;  %1231 = vmatpush3.bf16.msra.mxu1 %v1437_v49 }
  0x94   :  { %1232 = vmatprep.subr.bf16.mxu1 %v1438_v50 }
  0x96   :  { %811 = vmatpush1.bf16.msra.mxu0 %v1375_v26 }
  0x97   :  { %812 = vmatprep.subr.bf16.mxu0 %v1383_v28  ;;  %1233 = vmatpush3.bf16.msra.mxu1 %v1439_v51 }
  0x98   :  { %1234 = vmatprep.subr.bf16.mxu1 %v1440_v52 }
  0x9a   :  { %813 = vmatpush1.bf16.msra.mxu0 %v1381_v30 }
  0x9b   :  { %814 = vmatprep.subr.bf16.mxu0 %v1389_v32  ;;  %1235 = vmatpush3.bf16.msra.mxu1 %v1441_v53 }
  0x9c   :  { %1236 = vmatprep.subr.bf16.mxu1 %v1442_v54 }
  0x9e   :  { %815 = vmatpush1.bf16.msra.mxu0 %v1387_v34 }
  0x9f   :  { %816 = vmatprep.subr.bf16.mxu0 %v1395_v35  ;;  %1237 = vmatpush3.bf16.msra.mxu1 %v1443_v55  ;;  %v1198_v35 = vld [vmem:[%s1645_s4] ss:$0 sm:$0xff] }
  0xa0   :  { %1238 = vmatprep.subr.bf16.mxu1 %v1444_v56 }
  0xa2   :  { %817 = vmatpush1.bf16.msra.mxu0 %v1393_v36 }
  0xa3   :  { %818 = vmatprep.subr.bf16.mxu0 %v1401_v37  ;;  %1239 = vmatpush3.bf16.msra.mxu1 %v1445_v57 }
  0xa6   :  { %819 = vmatpush1.bf16.msra.mxu0 %v1399_v38 }
  0xa7   :  { %820 = vmatprep.subr.bf16.mxu0 %v1407_v39 }
  0xaa   :  { %821 = vmatpush1.bf16.msra.mxu0 %v1405_v40 }
  0xab   :  { %822 = vmatprep.subr.bf16.mxu0 %v1413_v41 }
  0xae   :  { %823 = vmatpush1.bf16.msra.mxu0 %v1411_v42 }
  0xaf   :  { %824 = vmatprep.subr.bf16.mxu0 %v1419_v43 }
  0xb2   :  { %825 = vmatpush1.bf16.msra.mxu0 %v1417_v44 }
  0xb3   :  { %826 = vmatprep.subr.bf16.mxu0 %v1425_v45 }
  0xb6   :  { %827 = vmatpush1.bf16.msra.mxu0 %v1423_v46 }
  0xb9   :  { %829 = vmatmul.mubr.bf16.vlgmr.msra.gmra.mrb[0].mxu0 %v1426_v47 }
 0x151   :  { %v744_v58 = vpop.f32.mrb[0].mxu1 }
 0x152   :  { %v746_v59 = vpop.f32.mrb[1].mxu1  ;;  %v745_v9 = vadd.f32 %v744_v58, %v174_v7 }
 0x153   :  { %v748_v60 = vpop.f32.mrb[2].mxu1  ;;  %v747_v10 = vadd.f32 %v746_v59, %v178_v8 }
 0x154   :  { %v750_v61 = vpop.f32.mrb[3].mxu1  ;;  %v749_v12 = vadd.f32 %v748_v60, %v174_v7 }
 0x155   :  { %v751_v15 = vadd.f32 %v750_v61, %v178_v8 }
 0x159   :  { %v873_v62 = vpop.f32.mrb[4].mxu1 }
 0x15a   :  { %v875_v63 = vpop.f32.mrb[5].mxu1 }
 0x15b   :  { %v877_v0 = vpop.f32.mrb[6].mxu1 }
 0x15c   :  { %v879_v1 = vpop.f32.mrb[7].mxu1 }
 0x18c   :  { %v830_v11 = vpop.f32.mrb[0].mxu0 }
 0x18d   :  { %v1247_v13 = vadd.f32 %v830_v11, %v745_v9  ;;  %v832_v14 = vpop.f32.mrb[1].mxu0 }
 0x18e   :  { %v1250_v16 = vadd.f32 %v832_v14, %v747_v10  ;;  %v834_v17 = vpop.f32.mrb[2].mxu0 }
 0x18f   :  { %v1248_v18 = vadd.f32 %v1247_v13, %v873_v62  ;;  %v1253_v19 = vadd.f32 %v834_v17, %v749_v12  ;;  %v836_v20 = vpop.f32.mrb[3].mxu0 }
 0x190   :  { %v1251_v21 = vadd.f32 %v1250_v16, %v875_v63  ;;  %v1256_v22 = vadd.f32 %v836_v20, %v751_v15 }
 0x191   :  { %v1254_v23 = vadd.f32 %v1253_v19, %v877_v0  ;;  %v882_v25 = vmax.f32 %v1248_v18, 0.0 }
 0x192   :  { %v1257_v24 = vadd.f32 %v1256_v22, %v879_v1  ;;  %v883_v27 = vmax.f32 %v1251_v21, 0.0 }
 0x193   :  { %v884_v26 = vmax.f32 %v1254_v23, 0.0 }
 0x194   :  { %v885_v28 = vmax.f32 %v1257_v24, 0.0 }
 0x195   :  { %v886_v29 = vpack.c.bf16 %v884_v26, %v882_v25 }
 0x196   :  { %v887_v30 = vpack.c.bf16 %v885_v28, %v883_v27 }
 0x198   :  { %1055 = vmatprep.mubr.bf16.mxu1 %v887_v30 }
 0x199   :  { %1056 = vmatmul.mubr.bf16.vlgmr.msra.gmra.mrb[8].mxu1 %v886_v29 }
 0x26c   :  { %v1240_v31 = vpop.f32.mrb[8].mxu1 }
 0x26d   :  { %v1241_v32 = vpop.f32.mrb[9].mxu1 }
 0x26e   :  { %v1242_v33 = vadd.f32 %v1241_v32, %v1240_v31  ;;  %v1243_v34 = vpop.f32.mrb[10].mxu1 }
 0x26f   :  { %v1244_v36 = vpop.f32.mrb[11].mxu1 }
 0x270   :  { %v1245_v37 = vadd.f32 %v1244_v36, %v1243_v34  ;;  %v1058_v38 = vadd.f32 %v1242_v33, %v1198_v35 }
 0x272   :  { %v1061_v39 = vadd.f32 %v1245_v37, %v1198_v35 }
 0x274   :  { %v1222_v40 = vpack.c.bf16 %v1061_v39, %v1058_v38 }
 0x276   :  { %1223 = vst [vmem:[#allocation8] sm:$0xff] %v1222_v40  }
 0x277   :  { %1523 = shalt.err (!%p1520_p0)
}
 0x278   :  { %s1524_s4 = scalar_lea.hbm %s1646_s5, 128 }
 0x279   :  { %p1525_p1 = scmp.ne.s32.totalorder %s1646_s5, %s1524_s4  ;;  %p1528_p2 = scmp.lt.u32.totalorder %s1524_s4, %s1646_s5 }
 0x27b   :  { %p1530_p3 = pnand %p1528_p2, %p1525_p1 }
 0x27d   :  { %1533 = shalt.err (!%p1530_p3)
}
 0x27e   :  { %1085 = dma.vmem_to_hbm [thread:$0]  %s1080_s11, 128, %s1646_s5, [#allocation4], %s1547_s0, %s1547_s0, %s1548_s30  }
 0x27f   :  { %1538 = dma.done.wait [#allocation4], 128  }
 0x280   :  { %1539 = vsyncadd [#allocation4], 4294967168 }
 0x281   :  { %1089 = vsyncpa [#allocation3], 1 }
 0x282   :  { %1090 = vsyncpa [#allocation6], 1 }
 0x283   :  { %1091 = vsyncpa [#allocation4], 1 }

</bundles_post_ra>
